<compile_context>
chip_gen: v7x
topology: tpu7x:2x2x1
jax: 0.10.0
libtpu: 0.0.40
codegen_flags: <defaults>
</compile_context>

<pallas_src>
import functools

import jax
import jax.numpy as jnp
from jax.experimental import pallas as pl
from jax.experimental.pallas import tpu as pltpu

LANE = 128
SUBLANE = 8


def _round_up(n, m):
    return ((n + m - 1) // m) * m


def mlp_kernel(x_ref, w1_ref, b1_ref, w2_ref, b2_ref, w3_ref, b3_ref, o_ref):
    # One batch tile per grid step; all three (sub-128) matmuls + activations
    # fused.  Weights/biases are VMEM-resident across steps.
    x = x_ref[...]
    h = jnp.dot(x, w1_ref[...], preferred_element_type=jnp.float32) + b1_ref[...]
    h = jnp.maximum(h, 0.0)                                        # ReLU
    h = jnp.dot(h, w2_ref[...], preferred_element_type=jnp.float32) + b2_ref[...]
    h = jnp.maximum(h, 0.0)                                        # ReLU
    logits = jnp.dot(h, w3_ref[...], preferred_element_type=jnp.float32) + b3_ref[...]
    o_ref[...] = jax.nn.sigmoid(logits).astype(o_ref.dtype)        # Sigmoid


@functools.partial(jax.jit, static_argnames=("tb",))
def user_model_nn_forward(x, params, *, tb=512):
    """Forward pass of UserModelNN via a batch-gridded Pallas kernel."""
    w1, b1, w2, b2, w3, b3 = params
    B, in_dim = x.shape
    hid = w1.shape[1]
    out_dim = w3.shape[1]

    # ---- one-time host/XLA-side zero pads to make hidden & output lane-dense.
    hid_p = _round_up(hid, LANE)
    out_p = _round_up(out_dim, LANE)
    w1p = jnp.pad(w1, ((0, 0), (0, hid_p - hid)))
    b1p = jnp.pad(b1, ((0, 0), (0, hid_p - hid)))
    w2p = jnp.pad(w2, ((0, hid_p - hid), (0, hid_p - hid)))
    b2p = jnp.pad(b2, ((0, 0), (0, hid_p - hid)))
    w3p = jnp.pad(w3, ((0, hid_p - hid), (0, out_p - out_dim)))
    b3p = jnp.pad(b3, ((0, 0), (0, out_p - out_dim)))

    # ---- batch tiling: large tiles (>=512 rows) when B is big; pad the tail.
    TB = min(int(tb), _round_up(B, SUBLANE))
    TB = _round_up(TB, SUBLANE)
    Bp = _round_up(B, TB)
    xp = jnp.pad(x, ((0, Bp - B), (0, 0)))
    grid = (Bp // TB,)

    # Resident (non-streamed) operand spec: same block every grid step.
    def resident(shape):
        return pl.BlockSpec(shape, lambda i: (0, 0))

    cost = pl.CostEstimate(
        flops=2 * B * (in_dim * hid + hid * hid + hid * out_dim),
        transcendentals=B * out_dim,  # sigmoid exp per output element
        bytes_accessed=B * (in_dim + out_dim) * 4
        + (in_dim * hid + hid * hid + hid * out_dim + 2 * hid + out_dim) * 4,
    )

    out_padded = pl.pallas_call(
        mlp_kernel,
        out_shape=jax.ShapeDtypeStruct((Bp, out_p), jnp.float32),
        grid=grid,
        in_specs=[
            pl.BlockSpec((TB, in_dim), lambda i: (i, 0)),   # streamed x tiles
            resident(w1p.shape), resident(b1p.shape),
            resident(w2p.shape), resident(b2p.shape),
            resident(w3p.shape), resident(b3p.shape),
        ],
        out_specs=pl.BlockSpec((TB, out_p), lambda i: (i, 0)),  # lane-dense out
        compiler_params=pltpu.CompilerParams(
            dimension_semantics=("parallel",),    # v7x: shard batch over 2 TCs
            vmem_limit_bytes=32 * 1024 * 1024,    # explicit; fits v7x's 64 MiB
        ),
        cost_estimate=cost,
    )(xp, w1p, b1p, w2p, b2p, w3p, b3p)

    return out_padded[:B, :out_dim]


def init_params(key, input_dim=20, hidden_dim=50, output_dim=10):
    """Deterministic init mimicking nn.Linear's uniform(-1/sqrt(fan_in), 1/sqrt(fan_in))."""
    ks = jax.random.split(key, 6)

    def linear(kw, kb, fan_in, fan_out):
        bound = 1.0 / jnp.sqrt(jnp.float32(fan_in))
        w = jax.random.uniform(kw, (fan_in, fan_out), jnp.float32, -bound, bound)
        b = jax.random.uniform(kb, (1, fan_out), jnp.float32, -bound, bound)
        return w, b

    w1, b1 = linear(ks[0], ks[1], input_dim, hidden_dim)
    w2, b2 = linear(ks[2], ks[3], hidden_dim, hidden_dim)
    w3, b3 = linear(ks[4], ks[5], hidden_dim, output_dim)
    return (w1, b1, w2, b2, w3, b3)


def reference_forward(x, params):
    w1, b1, w2, b2, w3, b3 = params
    h = jnp.maximum(x @ w1 + b1, 0.0)
    h = jnp.maximum(h @ w2 + b2, 0.0)
    return jax.nn.sigmoid(h @ w3 + b3)


if __name__ == "__main__":
    key = jax.random.PRNGKey(0)
    k_x, k_x2, k_p = jax.random.split(key, 3)

    input_dim, hidden_dim, output_dim = 20, 50, 10
    params = init_params(k_p, input_dim, hidden_dim, output_dim)

    # Small primary test (single grid step).
    batch = 8
    x = jax.random.normal(k_x, (batch, input_dim), jnp.float32)
    out = jax.block_until_ready(user_model_nn_forward(x, params))
    ref = reference_forward(x, params)
    assert out.shape == (batch, output_dim)
    assert jnp.allclose(out, ref, atol=1e-5, rtol=1e-5)

    # Exercise the multi-step batch grid + ragged-tail padding path.
    batch2 = 300
    x2 = jax.random.normal(k_x2, (batch2, input_dim), jnp.float32)
    out2 = jax.block_until_ready(user_model_nn_forward(x2, params, tb=128))
    ref2 = reference_forward(x2, params)
    assert out2.shape == (batch2, output_dim)
    assert jnp.allclose(out2, ref2, atol=1e-5, rtol=1e-5)

    print("KERNEL_OK")
</pallas_src>

<mosaic_0001>
module attributes {stable_mosaic.version = 11 : i64} {
  func.func @mlp_kernel(%arg0: i32, %arg1: memref<8x20xf32, #tpu.memory_space<vmem>>, %arg2: memref<20x128xf32, #tpu.memory_space<vmem>>, %arg3: memref<1x128xf32, #tpu.memory_space<vmem>>, %arg4: memref<128x128xf32, #tpu.memory_space<vmem>>, %arg5: memref<1x128xf32, #tpu.memory_space<vmem>>, %arg6: memref<128x128xf32, #tpu.memory_space<vmem>>, %arg7: memref<1x128xf32, #tpu.memory_space<vmem>>, %arg8: memref<8x128xf32, #tpu.memory_space<vmem>>) attributes {dimension_semantics = [#tpu.dimension_semantics<parallel>], iteration_bounds = array<i64: 1>, scalar_prefetch = 0 : i64, scratch_operands = 0 : i64, tpu.core_type = #tpu.core_type<tc>, window_params = [{transform_indices = @transform_0, window_bounds = array<i64: 8, 20>}, {pipeline_mode = #tpu.pipeline_mode<synchronous>, transform_indices = @transform_1, window_bounds = array<i64: 20, 128>}, {pipeline_mode = #tpu.pipeline_mode<synchronous>, transform_indices = @transform_2, window_bounds = array<i64: 1, 128>}, {pipeline_mode = #tpu.pipeline_mode<synchronous>, transform_indices = @transform_3, window_bounds = array<i64: 128, 128>}, {pipeline_mode = #tpu.pipeline_mode<synchronous>, transform_indices = @transform_4, window_bounds = array<i64: 1, 128>}, {pipeline_mode = #tpu.pipeline_mode<synchronous>, transform_indices = @transform_5, window_bounds = array<i64: 128, 128>}, {pipeline_mode = #tpu.pipeline_mode<synchronous>, transform_indices = @transform_6, window_bounds = array<i64: 1, 128>}, {transform_indices = @transform_7, window_bounds = array<i64: 8, 128>}]} {
    %c0 = arith.constant 0 : index
    %c0_0 = arith.constant 0 : index
    %0 = vector.load %arg1[%c0, %c0_0] : memref<8x20xf32, #tpu.memory_space<vmem>>, vector<8x20xf32>
    %c0_1 = arith.constant 0 : index
    %c0_2 = arith.constant 0 : index
    %1 = vector.load %arg2[%c0_1, %c0_2] : memref<20x128xf32, #tpu.memory_space<vmem>>, vector<20x128xf32>
    %cst = arith.constant dense<0.000000e+00> : vector<8x128xf32>
    %2 = tpu.matmul %0, %1, %cst {dimension_numbers = #tpu.dot_dimension_numbers<[1], [0], [0], [1], [0, 0, 1, 1], [], []>} : vector<8x20xf32>, vector<20x128xf32>, vector<8x128xf32> -> vector<8x128xf32>
    %c0_3 = arith.constant 0 : index
    %c0_4 = arith.constant 0 : index
    %3 = vector.load %arg3[%c0_3, %c0_4] : memref<1x128xf32, #tpu.memory_space<vmem>>, vector<1x128xf32>
    %4 = vector.broadcast %3 : vector<1x128xf32> to vector<8x128xf32>
    %5 = arith.addf %2, %4 : vector<8x128xf32>
    %cst_5 = arith.constant 0.000000e+00 : f32
    %6 = vector.broadcast %cst_5 : f32 to vector<8x128xf32>
    %7 = arith.maximumf %5, %6 : vector<8x128xf32>
    %c0_6 = arith.constant 0 : index
    %c0_7 = arith.constant 0 : index
    %8 = vector.load %arg4[%c0_6, %c0_7] : memref<128x128xf32, #tpu.memory_space<vmem>>, vector<128x128xf32>
    %cst_8 = arith.constant dense<0.000000e+00> : vector<8x128xf32>
    %9 = tpu.matmul %7, %8, %cst_8 {dimension_numbers = #tpu.dot_dimension_numbers<[1], [0], [0], [1], [0, 0, 1, 1], [], []>} : vector<8x128xf32>, vector<128x128xf32>, vector<8x128xf32> -> vector<8x128xf32>
    %c0_9 = arith.constant 0 : index
    %c0_10 = arith.constant 0 : index
    %10 = vector.load %arg5[%c0_9, %c0_10] : memref<1x128xf32, #tpu.memory_space<vmem>>, vector<1x128xf32>
    %11 = vector.broadcast %10 : vector<1x128xf32> to vector<8x128xf32>
    %12 = arith.addf %9, %11 : vector<8x128xf32>
    %cst_11 = arith.constant 0.000000e+00 : f32
    %13 = vector.broadcast %cst_11 : f32 to vector<8x128xf32>
    %14 = arith.maximumf %12, %13 : vector<8x128xf32>
    %c0_12 = arith.constant 0 : index
    %c0_13 = arith.constant 0 : index
    %15 = vector.load %arg6[%c0_12, %c0_13] : memref<128x128xf32, #tpu.memory_space<vmem>>, vector<128x128xf32>
    %cst_14 = arith.constant dense<0.000000e+00> : vector<8x128xf32>
    %16 = tpu.matmul %14, %15, %cst_14 {dimension_numbers = #tpu.dot_dimension_numbers<[1], [0], [0], [1], [0, 0, 1, 1], [], []>} : vector<8x128xf32>, vector<128x128xf32>, vector<8x128xf32> -> vector<8x128xf32>
    %c0_15 = arith.constant 0 : index
    %c0_16 = arith.constant 0 : index
    %17 = vector.load %arg7[%c0_15, %c0_16] : memref<1x128xf32, #tpu.memory_space<vmem>>, vector<1x128xf32>
    %18 = vector.broadcast %17 : vector<1x128xf32> to vector<8x128xf32>
    %19 = arith.addf %16, %18 : vector<8x128xf32>
    %20 = arith.negf %19 : vector<8x128xf32>
    %21 = math.exp %20 : vector<8x128xf32>
    %cst_17 = arith.constant 1.000000e+00 : f32
    %22 = vector.broadcast %cst_17 : f32 to vector<8x128xf32>
    %23 = arith.addf %22, %21 : vector<8x128xf32>
    %24 = arith.divf %22, %23 : vector<8x128xf32>
    %c0_18 = arith.constant 0 : index
    %c0_19 = arith.constant 0 : index
    %25 = vector.load %arg8[%c0_18, %c0_19] : memref<8x128xf32, #tpu.memory_space<vmem>>, vector<8x128xf32>
    tpu.vector_store %arg8[%c0_18, %c0_19], %24 {strides = array<i32>} : memref<8x128xf32, #tpu.memory_space<vmem>>, vector<8x128xf32>,
    return
  }
  func.func @transform_0(%arg0: i32) -> (i32, i32) {
    %c0_i32 = arith.constant 0 : i32
    %c0_i32_0 = arith.constant 0 : i32
    return %arg0, %c0_i32 : i32, i32
  }
  func.func @transform_1(%arg0: i32) -> (i32, i32) {
    %c0_i32 = arith.constant 0 : i32
    %c0_i32_0 = arith.constant 0 : i32
    %c0_i32_1 = arith.constant 0 : i32
    return %c0_i32, %c0_i32_0 : i32, i32
  }
  func.func @transform_2(%arg0: i32) -> (i32, i32) {
    %c0_i32 = arith.constant 0 : i32
    %c0_i32_0 = arith.constant 0 : i32
    %c0_i32_1 = arith.constant 0 : i32
    return %c0_i32, %c0_i32_0 : i32, i32
  }
  func.func @transform_3(%arg0: i32) -> (i32, i32) {
    %c0_i32 = arith.constant 0 : i32
    %c0_i32_0 = arith.constant 0 : i32
    %c0_i32_1 = arith.constant 0 : i32
    return %c0_i32, %c0_i32_0 : i32, i32
  }
  func.func @transform_4(%arg0: i32) -> (i32, i32) {
    %c0_i32 = arith.constant 0 : i32
    %c0_i32_0 = arith.constant 0 : i32
    %c0_i32_1 = arith.constant 0 : i32
    return %c0_i32, %c0_i32_0 : i32, i32
  }
  func.func @transform_5(%arg0: i32) -> (i32, i32) {
    %c0_i32 = arith.constant 0 : i32
    %c0_i32_0 = arith.constant 0 : i32
    %c0_i32_1 = arith.constant 0 : i32
    return %c0_i32, %c0_i32_0 : i32, i32
  }
  func.func @transform_6(%arg0: i32) -> (i32, i32) {
    %c0_i32 = arith.constant 0 : i32
    %c0_i32_0 = arith.constant 0 : i32
    %c0_i32_1 = arith.constant 0 : i32
    return %c0_i32, %c0_i32_0 : i32, i32
  }
  func.func @transform_7(%arg0: i32) -> (i32, i32) {
    %c0_i32 = arith.constant 0 : i32
    %c0_i32_0 = arith.constant 0 : i32
    return %arg0, %c0_i32 : i32, i32
  }
}

</mosaic_0001>

<bundles_post_ra>
// kernel: user_model_nn_forward.1
= control target key start
LH: loop header
LB: loop body
LE: loop exit
PB: predicated region body
PF: predicated region fallthrough
CT: control target
= control target key end

     0   :  { %v531_v2 = vmov 0.0|0.0   ;;  %vm532_vm0 = vmmov 0   ;;  %v533_v6 = vmov 0.0   ;;  %vm42_vm1 = vcmask 1043456   ;;  %s724_s0 = inlined_call_operand.vmem [shape: f32[8,20], index: 0, kind: input, shape index: {}]   ;;  %s725_s1 = inlined_call_operand.vmem [shape: f32[20,128], index: 1, kind: input, shape index: {}]   ;;  %s726_s2 = inlined_call_operand.vmem [shape: f32[1,128], index: 2, kind: input, shape index: {}]   ;;  %s727_s3 = inlined_call_operand.vmem [shape: f32[128,128], index: 3, kind: input, shape index: {}]   ;;  %s728_s4 = inlined_call_operand.vmem [shape: f32[1,128], index: 4, kind: input, shape index: {}]   ;;  %s729_s5 = inlined_call_operand.vmem [shape: f32[128,128], index: 5, kind: input, shape index: {}]   ;;  %s730_s6 = inlined_call_operand.vmem [shape: f32[1,128], index: 6, kind: input, shape index: {}]   ;;  %s731_s7 = inlined_call_operand.hbm [shape: f32[8,128], index: 7, kind: output, shape index: {}]  }
   0x1   :  { %v28_v0 = vld [vmem:[%s725_s1] sm:$0xff]  ;;  %v29_v1 = vld [vmem:[%s725_s1 + $0x8] sm:$0xff]  ;;  %448 = vmatprep.subr.bf16.mxu0 %v531_v2  ;;  %451 = vmatprep.subr.bf16.mxu1 %v531_v2  ;;  %v119_v8 = vld [vmem:[%s727_s3 + $0x10] sm:$0xff]  ;;  %vm38_vm2 = vcmask 162816  }
   0x2   :  { %v449_v3 = vpack.c.bf16 %v29_v1, %v28_v0  ;;  %v117_v4 = vld [vmem:[%s727_s3] sm:$0xff]  ;;  %v118_v5 = vld [vmem:[%s727_s3 + $0x8] sm:$0xff]  ;;  %375 = vmatprep.mubr.msk.f32.mxu0 %vm532_vm0, %v533_v6  ;;  %v120_v9 = vld [vmem:[%s727_s3 + $0x18] sm:$0xff]  ;;  %410 = vmatprep.mubr.msk.f32.mxu1 %vm532_vm0, %v533_v6 }
   0x3   :  { %v452_v7 = vpack.c.bf16 %v118_v5, %v117_v4  ;;  %v30_v10 = vld [vmem:[%s725_s1 + $0x10] sm:$0xf]  ;;  %v455_v11 = vpack.c.bf16 %v120_v9, %v119_v8  ;;  %v27_v12 = vld [vmem:[%s724_s0] sm:$0xff]  ;;  %v122_v14 = vld [vmem:[%s727_s3 + $0x28] sm:$0xff] }
   0x4   :  { %450 = vmatpush3.bf16.msra.mxu0 %v449_v3  ;;  %v121_v13 = vld [vmem:[%s727_s3 + $0x20] sm:$0xff] }
   0x5   :  { %373 = vmatprep.subr.mxu0 %v533_v6  ;;  %453 = vmatpush3.bf16.msra.mxu1 %v452_v7 }
   0x6   :  { %454 = vmatprep.subr.bf16.mxu1 %v531_v2 }
   0x7   :  { %12 = vsyncpa [#allocation3], 0  ;;  %v458_v15 = vpack.c.bf16 %v122_v14, %v121_v13  ;;  %v123_v16 = vld [vmem:[%s727_s3 + $0x30] sm:$0xff]  ;;  %v124_v17 = vld [vmem:[%s727_s3 + $0x38] sm:$0xff] }
   0x8   :  { %374 = vmatpush3.msk.msra.mxu0 %vm42_vm1, %v30_v10  ;;  %v461_v18 = vpack.c.bf16 %v124_v17, %v123_v16  ;;  %v125_v19 = vld [vmem:[%s727_s3 + $0x40] sm:$0xff]  ;;  %v126_v20 = vld [vmem:[%s727_s3 + $0x48] sm:$0xff]  ;;  %v127_v22 = vld [vmem:[%s727_s3 + $0x50] sm:$0xff] }
   0x9   :  { %376 = vmatmul.mubr.msk.f32.vlgmr.msra.gmra.mrb[0].mxu0 %vm38_vm2, %v27_v12  ;;  %456 = vmatpush3.bf16.msra.mxu1 %v455_v11  ;;  %v464_v21 = vpack.c.bf16 %v126_v20, %v125_v19  ;;  %v128_v23 = vld [vmem:[%s727_s3 + $0x58] sm:$0xff]  ;;  %v129_v25 = vld [vmem:[%s727_s3 + $0x60] sm:$0xff]  ;;  %v130_v26 = vld [vmem:[%s727_s3 + $0x68] sm:$0xff] }
   0xa   :  { %457 = vmatprep.subr.bf16.mxu1 %v531_v2  ;;  %475 = vmatprep.subr.bf16.mxu0 %v531_v2  ;;  %v467_v24 = vpack.c.bf16 %v128_v23, %v127_v22  ;;  %v470_v27 = vpack.c.bf16 %v130_v26, %v129_v25  ;;  %v131_v28 = vld [vmem:[%s727_s3 + $0x70] sm:$0xff]  ;;  %v132_v29 = vld [vmem:[%s727_s3 + $0x78] sm:$0xff]  ;;  %v211_v31 = vld [vmem:[%s729_s5] sm:$0xff] }
   0xb   :  { %445 = vmatprep.mubr.msk.f32.mxu0 %vm532_vm0, %v533_v6  ;;  %v473_v30 = vpack.c.bf16 %v132_v29, %v131_v28  ;;  %v212_v32 = vld [vmem:[%s729_s5 + $0x8] sm:$0xff]  ;;  %v213_v33 = vld [vmem:[%s729_s5 + $0x10] sm:$0xff]  ;;  %v214_v35 = vld [vmem:[%s729_s5 + $0x18] sm:$0xff] }
   0xc   :  { %v476_v34 = vpack.c.bf16 %v212_v32, %v211_v31  ;;  %v479_v36 = vpack.c.bf16 %v214_v35, %v213_v33  ;;  %v215_v37 = vld [vmem:[%s729_s5 + $0x20] sm:$0xff]  ;;  %v216_v38 = vld [vmem:[%s729_s5 + $0x28] sm:$0xff]  ;;  %v217_v40 = vld [vmem:[%s729_s5 + $0x30] sm:$0xff] }
   0xd   :  { %459 = vmatpush3.bf16.msra.mxu1 %v458_v15  ;;  %v482_v39 = vpack.c.bf16 %v216_v38, %v215_v37  ;;  %v218_v41 = vld [vmem:[%s729_s5 + $0x38] sm:$0xff]  ;;  %v219_v43 = vld [vmem:[%s729_s5 + $0x40] sm:$0xff]  ;;  %v220_v44 = vld [vmem:[%s729_s5 + $0x48] sm:$0xff] }
   0xe   :  { %460 = vmatprep.subr.bf16.mxu1 %v531_v2  ;;  %477 = vmatpush3.bf16.msra.mxu0 %v476_v34  ;;  %v485_v42 = vpack.c.bf16 %v218_v41, %v217_v40  ;;  %v488_v45 = vpack.c.bf16 %v220_v44, %v219_v43  ;;  %v221_v46 = vld [vmem:[%s729_s5 + $0x50] sm:$0xff]  ;;  %v222_v47 = vld [vmem:[%s729_s5 + $0x58] sm:$0xff]  ;;  %v223_v49 = vld [vmem:[%s729_s5 + $0x60] sm:$0xff] }
   0xf   :  { %478 = vmatprep.subr.bf16.mxu0 %v531_v2  ;;  %v491_v48 = vpack.c.bf16 %v222_v47, %v221_v46  ;;  %v224_v50 = vld [vmem:[%s729_s5 + $0x68] sm:$0xff]  ;;  %v325_v52 = vld [vmem:[%s726_s2] ss:$0 sm:$0xff]  ;;  %v225_v57 = vld [vmem:[%s729_s5 + $0x70] sm:$0xff] }
  0x10   :  { %v494_v51 = vpack.c.bf16 %v224_v50, %v223_v49  ;;  %v226_v58 = vld [vmem:[%s729_s5 + $0x78] sm:$0xff]  ;;  %v328_v60 = vld [vmem:[%s728_s4] ss:$0 sm:$0xff]  ;;  %s534_s5 = smov [#allocation2]  }
  0x11   :  { %462 = vmatpush3.bf16.msra.mxu1 %v461_v18  ;;  %v497_v59 = vpack.c.bf16 %v226_v58, %v225_v57  ;;  %v329_v1 = vld [vmem:[%s730_s6] ss:$0 sm:$0xff]  ;;  %s317_s24 = sshll.u32 %s534_s5, 4  ;;  %s318_s24 = int_to_ptr.vmem [resolvable:$true] %s317_s24 }
  0x12   :  { %463 = vmatprep.subr.bf16.mxu1 %v531_v2  ;;  %480 = vmatpush3.bf16.msra.mxu0 %v479_v36  ;;  %s507_s4 = scalar_lea.vmem %s318_s24, 128  ;;  %p512_p1 = scmp.lt.s32.totalorder %s318_s24, %s318_s24 }
  0x13   :  { %481 = vmatprep.subr.bf16.mxu0 %v531_v2  ;;  %p508_p0 = scmp.ne.s32.totalorder %s318_s24, %s507_s4  ;;  %p513_p2 = scmp.lt.s32.totalorder %s507_s4, %s507_s4 }
  0x15   :  { %465 = vmatpush3.bf16.msra.mxu1 %v464_v21  ;;  %p514_p3 = por %p513_p2, %p512_p1 }
  0x16   :  { %466 = vmatprep.subr.bf16.mxu1 %v531_v2  ;;  %483 = vmatpush3.bf16.msra.mxu0 %v482_v39 }
  0x17   :  { %484 = vmatprep.subr.bf16.mxu0 %v531_v2  ;;  %p515_p4 = pnand %p514_p3, %p508_p0 }
  0x19   :  { %468 = vmatpush3.bf16.msra.mxu1 %v467_v24 }
  0x1a   :  { %469 = vmatprep.subr.bf16.mxu1 %v531_v2  ;;  %486 = vmatpush3.bf16.msra.mxu0 %v485_v42 }
  0x1b   :  { %487 = vmatprep.subr.bf16.mxu0 %v531_v2 }
  0x1d   :  { %471 = vmatpush3.bf16.msra.mxu1 %v470_v27 }
  0x1e   :  { %472 = vmatprep.subr.bf16.mxu1 %v531_v2  ;;  %489 = vmatpush3.bf16.msra.mxu0 %v488_v45 }
  0x1f   :  { %490 = vmatprep.subr.bf16.mxu0 %v531_v2 }
  0x21   :  { %474 = vmatpush3.bf16.msra.mxu1 %v473_v30 }
  0x22   :  { %492 = vmatpush3.bf16.msra.mxu0 %v491_v48 }
  0x23   :  { %493 = vmatprep.subr.bf16.mxu0 %v531_v2 }
  0x26   :  { %495 = vmatpush3.bf16.msra.mxu0 %v494_v51 }
  0x27   :  { %496 = vmatprep.subr.bf16.mxu0 %v531_v2 }
  0x2a   :  { %498 = vmatpush3.bf16.msra.mxu0 %v497_v59 }
  0xdc   :  { %v112_v53 = vpop.f32.mrb[0].mxu0 }
  0xdd   :  { %v113_v54 = vadd.f32 %v325_v52, %v112_v53  ;;  %v377_v55 = vpop.f32.mrb[1].mxu0 }
  0xdf   :  { %v116_v56 = vmax.f32 %v113_v54, 0.0 }
  0xe1   :  { %411 = vmatmul.mubr.f32.vlgmr.msra.gmra.mrb[0].mxu1 %v116_v56 }
 0x1b4   :  { %v206_v61 = vpop.f32.mrb[0].mxu1 }
 0x1b5   :  { %v207_v62 = vadd.f32 %v328_v60, %v206_v61  ;;  %v412_v63 = vpop.f32.mrb[1].mxu1 }
 0x1b7   :  { %v210_v0 = vmax.f32 %v207_v62, 0.0 }
 0x1b9   :  { %446 = vmatmul.mubr.f32.vlgmr.msra.gmra.mrb[2].mxu0 %v210_v0 }
 0x28c   :  { %v300_v2 = vpop.f32.mrb[2].mxu0 }
 0x28d   :  { %v301_v3 = vadd.f32 %v329_v1, %v300_v2  ;;  %v447_v4 = vpop.f32.mrb[3].mxu0 }
 0x28f   :  { %v330_v5 = vmul.f32 -1.442695, %v301_v3 }
 0x291   :  { %503 = vpow2.f32 %v330_v5 }
 0x29b   :  { %v504_v6 = vpop.eup %503 }
 0x29c   :  { %v307_v7 = vadd.f32 1.0, %v504_v6 }
 0x29e   :  { %505 = vrcp.f32 %v307_v7 }
 0x2a8   :  { %v506_v8 = vpop.eup %505 }
 0x2a9   :  { %310 = vst [vmem:[#allocation2] sm:$0xff] %v506_v8 }
 0x2aa   :  { %518 = shalt.err (!%p515_p4)
}
 0x2ab   :  { %s519_s26 = scalar_lea.hbm %s731_s7, 128 }
 0x2ac   :  { %p520_p5 = scmp.ne.s32.totalorder %s731_s7, %s519_s26  ;;  %p523_p6 = scmp.lt.u32.totalorder %s519_s26, %s731_s7 }
 0x2ae   :  { %p525_p7 = pnand %p523_p6, %p520_p5 }
 0x2b0   :  { %528 = shalt.err (!%p525_p7)
}
 0x2b1   :  { %320 = dma.vmem_to_hbm [thread:$0]  %s318_s24, 128, %s731_s7, [#allocation3]  }
 0x2b2   :  { %529 = dma.done.wait [#allocation3], 128  }
 0x2b3   :  { %530 = vsyncadd [#allocation3], 4294967168 }
 0x2b4   :  { %324 = vsyncpa [#allocation3], 1 }

</bundles_post_ra>
